<compile_context>
chip_gen: v6e
topology: v6e:2x2x1
jax: 0.10.0
libtpu: 0.0.40
codegen_flags: <defaults>
</compile_context>

<pallas_src>
import functools

import jax
import jax.numpy as jnp
from jax.experimental import pallas as pl
from jax.experimental.pallas import tpu as pltpu


# ---------------------------------------------------------------------------
# Shared per-batch forward body: (T,) tokens -> padded logits (T, Vp) f32
# ---------------------------------------------------------------------------
def _forward_logits(ids_ref, pos_ref, emb_ref, wq_ref, wk_ref, wv_ref,
                    wlm_ref, blm_ref):
    ids = ids_ref[...]                                    # (T, 1) int32
    T = ids.shape[0]
    Vp, D = emb_ref.shape                                 # padded vocab, emb dim

    # Token embedding lookup as one-hot @ table (MXU, bf16 operands, f32 accumulate).
    onehot = (jax.lax.broadcasted_iota(jnp.int32, (T, Vp), 1) == ids
              ).astype(jnp.bfloat16)
    tok = jnp.dot(onehot, emb_ref[...],
                  preferred_element_type=jnp.float32)     # (T, D) f32

    # Positional embeddings: (T, D) table, added directly (no per-batch tiling).
    x = tok + pos_ref[...]                                # (T, D) f32
    x_bf = x.astype(jnp.bfloat16)

    # Single causal attention head (no q/k/v bias, scale = head_size**-0.5).
    q = jnp.dot(x_bf, wq_ref[...], preferred_element_type=jnp.float32)   # (T, D)
    k = jnp.dot(x_bf, wk_ref[...], preferred_element_type=jnp.float32)   # (T, D)
    v = jnp.dot(x_bf, wv_ref[...], preferred_element_type=jnp.float32)   # (T, D)

    # Fold the softmax scale into q (T*D elems) instead of the (T, T) scores.
    q = q * (1.0 / (D ** 0.5))

    att = jax.lax.dot_general(                            # q @ k.T on the MXU
        q.astype(jnp.bfloat16), k.astype(jnp.bfloat16),
        (((1,), (1,)), ((), ())),
        preferred_element_type=jnp.float32)               # (T, T) f32

    # Plain causal mask (per batch element).
    row = jax.lax.broadcasted_iota(jnp.int32, (T, T), 0)
    col = jax.lax.broadcasted_iota(jnp.int32, (T, T), 1)
    att = jnp.where(row >= col, att, -1e30)

    # Softmax over keys (f32 math; EUP reciprocal).
    att = att - jnp.max(att, axis=-1, keepdims=True)
    p = jnp.exp(att)
    p = p * pl.reciprocal(jnp.sum(p, axis=-1, keepdims=True), approx=True)

    y = jnp.dot(p.astype(jnp.bfloat16), v.astype(jnp.bfloat16),
                preferred_element_type=jnp.float32)       # (T, D) f32

    # lm_head: Linear(D -> Vp) with bias (bias kept f32, pad columns are zero).
    logits = jnp.dot(y.astype(jnp.bfloat16), wlm_ref[...],
                     preferred_element_type=jnp.float32) + blm_ref[...]  # (T, Vp)
    return logits


# ---------------------------------------------------------------------------
# Kernels
# ---------------------------------------------------------------------------
def bigram_kernel(ids_ref, pos_ref, emb_ref, wq_ref, wk_ref, wv_ref,
                  wlm_ref, blm_ref, out_ref):
    out_ref[...] = _forward_logits(ids_ref, pos_ref, emb_ref, wq_ref, wk_ref,
                                   wv_ref, wlm_ref, blm_ref)


def bigram_train_kernel(ids_ref, tgt_ref, pos_ref, emb_ref, wq_ref, wk_ref,
                        wv_ref, wlm_ref, blm_ref, *out_refs,
                        vocab_size, write_logits):
    if write_logits:
        logits_ref, rowloss_ref = out_refs
    else:
        (rowloss_ref,) = out_refs

    logits = _forward_logits(ids_ref, pos_ref, emb_ref, wq_ref, wk_ref, wv_ref,
                             wlm_ref, blm_ref)            # (T, Vp) f32
    if write_logits:
        logits_ref[...] = logits

    # Per-row cross-entropy (matches F.cross_entropy on the un-padded vocab);
    # the mean over all B*T rows is a trivial reduce in the wrapper.
    T, Vp = logits.shape
    tgt = tgt_ref[...]                                    # (T, 1) int32
    colv = jax.lax.broadcasted_iota(jnp.int32, (T, Vp), 1)
    picked = jnp.sum(jnp.where(colv == tgt, logits, 0.0),
                     axis=-1, keepdims=True)              # (T, 1) target logit
    lg = jnp.where(colv < vocab_size, logits, -1e30)      # mask vocab padding
    m = jnp.max(lg, axis=-1, keepdims=True)
    lse = m + jnp.log(jnp.sum(jnp.exp(lg - m), axis=-1, keepdims=True))
    rowloss_ref[...] = lse - picked                       # (T, 1) f32


# ---------------------------------------------------------------------------
# Params (vocab padded to a multiple of 128; matmul weights stored as bf16)
# ---------------------------------------------------------------------------
def _round_up(x, m):
    return ((x + m - 1) // m) * m


def init_params(key, vocab_size, embedding_dim, context_size):
    Vp = _round_up(vocab_size, 128)
    ks = jax.random.split(key, 7)
    std = 0.02
    tok = jax.random.normal(ks[0], (vocab_size, embedding_dim), jnp.float32) * std
    wlm = jax.random.normal(ks[5], (embedding_dim, vocab_size), jnp.float32) * std
    blm = jax.random.normal(ks[6], (1, vocab_size), jnp.float32) * std
    return {
        "tok_emb": jnp.pad(tok, ((0, Vp - vocab_size), (0, 0))).astype(jnp.bfloat16),
        "pos_emb": jax.random.normal(ks[1], (context_size, embedding_dim),
                                     jnp.float32) * std,
        "wq": (jax.random.normal(ks[2], (embedding_dim, embedding_dim),
                                 jnp.float32) * std).astype(jnp.bfloat16),
        "wk": (jax.random.normal(ks[3], (embedding_dim, embedding_dim),
                                 jnp.float32) * std).astype(jnp.bfloat16),
        "wv": (jax.random.normal(ks[4], (embedding_dim, embedding_dim),
                                 jnp.float32) * std).astype(jnp.bfloat16),
        "w_lm": jnp.pad(wlm, ((0, 0), (0, Vp - vocab_size))).astype(jnp.bfloat16),
        "b_lm": jnp.pad(blm, ((0, 0), (0, Vp - vocab_size))),   # f32 bias
    }


# ---------------------------------------------------------------------------
# Forward wrapper
# ---------------------------------------------------------------------------
@functools.partial(jax.jit,
                   static_argnames=("vocab_size", "with_targets", "return_logits"))
def bigram_forward(params, input_ids, targets=None, *, vocab_size,
                   with_targets=False, return_logits=True):
    B, T = input_ids.shape
    Vp, D = params["tok_emb"].shape
    N = B * T

    ids = input_ids.astype(jnp.int32).reshape(N, 1)
    pos = params["pos_emb"][:T]                           # (T, D) f32, sent once

    # Per-batch-element blocks for token/target/output rows; constant block
    # indices for weights/pos so they stay VMEM-resident across grid steps.
    row_spec = pl.BlockSpec((T, 1), lambda b: (b, 0))
    pos_spec = pl.BlockSpec((T, D), lambda b: (0, 0))
    emb_spec = pl.BlockSpec((Vp, D), lambda b: (0, 0))
    w_spec = pl.BlockSpec((D, D), lambda b: (0, 0))
    wlm_spec = pl.BlockSpec((D, Vp), lambda b: (0, 0))
    blm_spec = pl.BlockSpec((1, Vp), lambda b: (0, 0))
    logits_spec = pl.BlockSpec((T, Vp), lambda b: (b, 0))
    rowloss_spec = pl.BlockSpec((T, 1), lambda b: (b, 0))

    cparams = pltpu.CompilerParams(dimension_semantics=("parallel",))

    if not with_targets:
        logits_p = pl.pallas_call(
            bigram_kernel,
            grid=(B,),
            out_shape=jax.ShapeDtypeStruct((N, Vp), jnp.float32),
            in_specs=[row_spec, pos_spec, emb_spec, w_spec, w_spec, w_spec,
                      wlm_spec, blm_spec],
            out_specs=logits_spec,
            compiler_params=cparams,
        )(ids, pos, params["tok_emb"], params["wq"], params["wk"], params["wv"],
          params["w_lm"], params["b_lm"])
        return logits_p[:, :vocab_size].reshape(B, T, vocab_size)

    tgt = targets.astype(jnp.int32).reshape(N, 1)
    if return_logits:
        out_shape = (jax.ShapeDtypeStruct((N, Vp), jnp.float32),
                     jax.ShapeDtypeStruct((N, 1), jnp.float32))
        out_specs = (logits_spec, rowloss_spec)
    else:
        # Loss-only path: skip the (N, Vp) f32 logits HBM writeback entirely.
        out_shape = jax.ShapeDtypeStruct((N, 1), jnp.float32)
        out_specs = rowloss_spec

    outs = pl.pallas_call(
        functools.partial(bigram_train_kernel, vocab_size=vocab_size,
                          write_logits=return_logits),
        grid=(B,),
        out_shape=out_shape,
        in_specs=[row_spec, row_spec, pos_spec, emb_spec, w_spec, w_spec, w_spec,
                  wlm_spec, blm_spec],
        out_specs=out_specs,
        compiler_params=cparams,
    )(ids, tgt, pos, params["tok_emb"], params["wq"], params["wk"], params["wv"],
      params["w_lm"], params["b_lm"])

    if return_logits:
        logits_p, rowloss = outs
        loss = jnp.sum(rowloss) / N
        # Matches BigramLanguageModel._reshape_tensors + F.cross_entropy.
        return logits_p[:, :vocab_size], loss
    rowloss = outs
    return jnp.sum(rowloss) / N


if __name__ == "__main__":
    # embedding_dim = 64 (fixed in __init__), vocab = 65 (char-level tokenizer),
    # batch = 2, seq = 8, context_size = 1024.
    B, T, D, V, CTX = 2, 8, 64, 65, 1024

    key = jax.random.PRNGKey(0)
    k_param, k_ids, k_tgt = jax.random.split(key, 3)

    params = init_params(k_param, V, D, CTX)
    input_ids = jax.random.randint(k_ids, (B, T), 0, V, dtype=jnp.int32)
    targets = jax.random.randint(k_tgt, (B, T), 0, V, dtype=jnp.int32)

    # Inference path (targets=None) -> logits of shape (B, T, V).
    logits = bigram_forward(params, input_ids, vocab_size=V)
    logits = jax.block_until_ready(logits)
    assert logits.shape == (B, T, V) and logits.dtype == jnp.float32

    # Training path -> (flattened logits, scalar cross-entropy loss).
    logits_flat, loss = bigram_forward(params, input_ids, targets,
                                       vocab_size=V, with_targets=True)
    jax.block_until_ready((logits_flat, loss))
    assert logits_flat.shape == (B * T, V)
    assert loss.shape == () and bool(jnp.isfinite(loss))

    # Loss-only path: no logits HBM writeback; must match the fused value.
    loss_only = bigram_forward(params, input_ids, targets, vocab_size=V,
                               with_targets=True, return_logits=False)
    loss_only = jax.block_until_ready(loss_only)
    assert bool(jnp.allclose(loss_only, loss, rtol=1e-6, atol=1e-6))

    print("KERNEL_OK")
</pallas_src>

<mosaic_0001>
module attributes {stable_mosaic.version = 11 : i64} {
  func.func @bigram_kernel(%arg0: i32, %arg1: memref<8x1xi32, #tpu.memory_space<vmem>>, %arg2: memref<8x64xf32, #tpu.memory_space<vmem>>, %arg3: memref<128x64xbf16, #tpu.memory_space<vmem>>, %arg4: memref<64x64xbf16, #tpu.memory_space<vmem>>, %arg5: memref<64x64xbf16, #tpu.memory_space<vmem>>, %arg6: memref<64x64xbf16, #tpu.memory_space<vmem>>, %arg7: memref<64x128xbf16, #tpu.memory_space<vmem>>, %arg8: memref<1x128xf32, #tpu.memory_space<vmem>>, %arg9: memref<8x128xf32, #tpu.memory_space<vmem>>) attributes {dimension_semantics = [#tpu.dimension_semantics<parallel>], iteration_bounds = array<i64: 2>, scalar_prefetch = 0 : i64, scratch_operands = 0 : i64, tpu.core_type = #tpu.core_type<tc>, window_params = [{transform_indices = @transform_0, window_bounds = array<i64: 8, 1>}, {pipeline_mode = #tpu.pipeline_mode<synchronous>, transform_indices = @transform_1, window_bounds = array<i64: 8, 64>}, {pipeline_mode = #tpu.pipeline_mode<synchronous>, transform_indices = @transform_2, window_bounds = array<i64: 128, 64>}, {pipeline_mode = #tpu.pipeline_mode<synchronous>, transform_indices = @transform_3, window_bounds = array<i64: 64, 64>}, {pipeline_mode = #tpu.pipeline_mode<synchronous>, transform_indices = @transform_4, window_bounds = array<i64: 64, 64>}, {pipeline_mode = #tpu.pipeline_mode<synchronous>, transform_indices = @transform_5, window_bounds = array<i64: 64, 64>}, {pipeline_mode = #tpu.pipeline_mode<synchronous>, transform_indices = @transform_6, window_bounds = array<i64: 64, 128>}, {pipeline_mode = #tpu.pipeline_mode<synchronous>, transform_indices = @transform_7, window_bounds = array<i64: 1, 128>}, {transform_indices = @transform_8, window_bounds = array<i64: 8, 128>}]} {
    %c0 = arith.constant 0 : index
    %c0_0 = arith.constant 0 : index
    %0 = vector.load %arg1[%c0, %c0_0] : memref<8x1xi32, #tpu.memory_space<vmem>>, vector<8x1xi32>
    %1 = tpu.iota {dimensions = array<i32: 1>} : vector<8x128xi32>
    %2 = vector.broadcast %0 : vector<8x1xi32> to vector<8x128xi32>
    %3 = arith.cmpi eq, %1, %2 : vector<8x128xi32>
    %4 = arith.extui %3 : vector<8x128xi1> to vector<8x128xi32>
    %5 = arith.sitofp %4 : vector<8x128xi32> to vector<8x128xf32>
    %6 = arith.truncf %5 : vector<8x128xf32> to vector<8x128xbf16>
    %c0_1 = arith.constant 0 : index
    %c0_2 = arith.constant 0 : index
    %7 = vector.load %arg3[%c0_1, %c0_2] : memref<128x64xbf16, #tpu.memory_space<vmem>>, vector<128x64xbf16>
    %cst = arith.constant dense<0.000000e+00> : vector<8x64xf32>
    %8 = tpu.matmul %6, %7, %cst {dimension_numbers = #tpu.dot_dimension_numbers<[1], [0], [0], [1], [0, 0, 1, 1], [], []>} : vector<8x128xbf16>, vector<128x64xbf16>, vector<8x64xf32> -> vector<8x64xf32>
    %c0_3 = arith.constant 0 : index
    %c0_4 = arith.constant 0 : index
    %9 = vector.load %arg2[%c0_3, %c0_4] : memref<8x64xf32, #tpu.memory_space<vmem>>, vector<8x64xf32>
    %10 = arith.addf %8, %9 : vector<8x64xf32>
    %11 = arith.truncf %10 : vector<8x64xf32> to vector<8x64xbf16>
    %c0_5 = arith.constant 0 : index
    %c0_6 = arith.constant 0 : index
    %12 = vector.load %arg4[%c0_5, %c0_6] : memref<64x64xbf16, #tpu.memory_space<vmem>>, vector<64x64xbf16>
    %cst_7 = arith.constant dense<0.000000e+00> : vector<8x64xf32>
    %13 = tpu.matmul %11, %12, %cst_7 {dimension_numbers = #tpu.dot_dimension_numbers<[1], [0], [0], [1], [0, 0, 1, 1], [], []>} : vector<8x64xbf16>, vector<64x64xbf16>, vector<8x64xf32> -> vector<8x64xf32>
    %c0_8 = arith.constant 0 : index
    %c0_9 = arith.constant 0 : index
    %14 = vector.load %arg5[%c0_8, %c0_9] : memref<64x64xbf16, #tpu.memory_space<vmem>>, vector<64x64xbf16>
    %cst_10 = arith.constant dense<0.000000e+00> : vector<8x64xf32>
    %15 = tpu.matmul %11, %14, %cst_10 {dimension_numbers = #tpu.dot_dimension_numbers<[1], [0], [0], [1], [0, 0, 1, 1], [], []>} : vector<8x64xbf16>, vector<64x64xbf16>, vector<8x64xf32> -> vector<8x64xf32>
    %c0_11 = arith.constant 0 : index
    %c0_12 = arith.constant 0 : index
    %16 = vector.load %arg6[%c0_11, %c0_12] : memref<64x64xbf16, #tpu.memory_space<vmem>>, vector<64x64xbf16>
    %cst_13 = arith.constant dense<0.000000e+00> : vector<8x64xf32>
    %17 = tpu.matmul %11, %16, %cst_13 {dimension_numbers = #tpu.dot_dimension_numbers<[1], [0], [0], [1], [0, 0, 1, 1], [], []>} : vector<8x64xbf16>, vector<64x64xbf16>, vector<8x64xf32> -> vector<8x64xf32>
    %cst_14 = arith.constant 1.250000e-01 : f32
    %18 = vector.broadcast %cst_14 : f32 to vector<8x64xf32>
    %19 = arith.mulf %13, %18 : vector<8x64xf32>
    %20 = arith.truncf %19 : vector<8x64xf32> to vector<8x64xbf16>
    %21 = arith.truncf %15 : vector<8x64xf32> to vector<8x64xbf16>
    %cst_15 = arith.constant dense<0.000000e+00> : vector<8x8xf32>
    %22 = tpu.matmul %20, %21, %cst_15 {dimension_numbers = #tpu.dot_dimension_numbers<[1], [1], [0], [0], [0, 0, 1, 0], [], []>} : vector<8x64xbf16>, vector<8x64xbf16>, vector<8x8xf32> -> vector<8x8xf32>
    %23 = tpu.iota {dimensions = array<i32: 0>} : vector<8x8xi32>
    %24 = tpu.iota {dimensions = array<i32: 1>} : vector<8x8xi32>
    %25 = arith.cmpi sge, %23, %24 : vector<8x8xi32>
    %cst_16 = arith.constant -1.000000e+30 : f32
    %26 = vector.broadcast %cst_16 : f32 to vector<8x8xf32>
    %27 = arith.select %25, %22, %26 : vector<8x8xi1>, vector<8x8xf32>
    %cst_17 = arith.constant dense<0xFF800000> : vector<8xf32>
    %28 = vector.multi_reduction <maximumf>, %27, %cst_17 [1] : vector<8x8xf32> to vector<8xf32>
    %29 = vector.shape_cast %28 : vector<8xf32> to vector<8x1xf32>
    %30 = vector.broadcast %29 : vector<8x1xf32> to vector<8x8xf32>
    %31 = arith.subf %27, %30 : vector<8x8xf32>
    %32 = math.exp %31 : vector<8x8xf32>
    %cst_18 = arith.constant dense<0.000000e+00> : vector<8xf32>
    %33 = vector.multi_reduction <add>, %32, %cst_18 [1] : vector<8x8xf32> to vector<8xf32>
    %34 = vector.shape_cast %33 : vector<8xf32> to vector<8x1xf32>
    %35 = tpu.reciprocal %34 {approx = true} : vector<8x1xf32> -> vector<8x1xf32>
    %36 = vector.broadcast %35 : vector<8x1xf32> to vector<8x8xf32>
    %37 = arith.mulf %32, %36 : vector<8x8xf32>
    %38 = arith.truncf %37 : vector<8x8xf32> to vector<8x8xbf16>
    %39 = arith.truncf %17 : vector<8x64xf32> to vector<8x64xbf16>
    %cst_19 = arith.constant dense<0.000000e+00> : vector<8x64xf32>
    %40 = tpu.matmul %38, %39, %cst_19 {dimension_numbers = #tpu.dot_dimension_numbers<[1], [0], [0], [1], [0, 0, 1, 1], [], []>} : vector<8x8xbf16>, vector<8x64xbf16>, vector<8x64xf32> -> vector<8x64xf32>
    %41 = arith.truncf %40 : vector<8x64xf32> to vector<8x64xbf16>
    %c0_20 = arith.constant 0 : index
    %c0_21 = arith.constant 0 : index
    %42 = vector.load %arg7[%c0_20, %c0_21] : memref<64x128xbf16, #tpu.memory_space<vmem>>, vector<64x128xbf16>
    %cst_22 = arith.constant dense<0.000000e+00> : vector<8x128xf32>
    %43 = tpu.matmul %41, %42, %cst_22 {dimension_numbers = #tpu.dot_dimension_numbers<[1], [0], [0], [1], [0, 0, 1, 1], [], []>} : vector<8x64xbf16>, vector<64x128xbf16>, vector<8x128xf32> -> vector<8x128xf32>
    %c0_23 = arith.constant 0 : index
    %c0_24 = arith.constant 0 : index
    %44 = vector.load %arg8[%c0_23, %c0_24] : memref<1x128xf32, #tpu.memory_space<vmem>>, vector<1x128xf32>
    %45 = vector.broadcast %44 : vector<1x128xf32> to vector<8x128xf32>
    %46 = arith.addf %43, %45 : vector<8x128xf32>
    %c0_25 = arith.constant 0 : index
    %c0_26 = arith.constant 0 : index
    %47 = vector.load %arg9[%c0_25, %c0_26] : memref<8x128xf32, #tpu.memory_space<vmem>>, vector<8x128xf32>
    tpu.vector_store %arg9[%c0_25, %c0_26], %46 {strides = array<i32>} : memref<8x128xf32, #tpu.memory_space<vmem>>, vector<8x128xf32>,
    return
  }
  func.func @transform_0(%arg0: i32) -> (i32, i32) {
    %c0_i32 = arith.constant 0 : i32
    %c0_i32_0 = arith.constant 0 : i32
    return %arg0, %c0_i32 : i32, i32
  }
  func.func @transform_1(%arg0: i32) -> (i32, i32) {
    %c0_i32 = arith.constant 0 : i32
    %c0_i32_0 = arith.constant 0 : i32
    %c0_i32_1 = arith.constant 0 : i32
    return %c0_i32, %c0_i32_0 : i32, i32
  }
  func.func @transform_2(%arg0: i32) -> (i32, i32) {
    %c0_i32 = arith.constant 0 : i32
    %c0_i32_0 = arith.constant 0 : i32
    %c0_i32_1 = arith.constant 0 : i32
    return %c0_i32, %c0_i32_0 : i32, i32
  }
  func.func @transform_3(%arg0: i32) -> (i32, i32) {
    %c0_i32 = arith.constant 0 : i32
    %c0_i32_0 = arith.constant 0 : i32
    %c0_i32_1 = arith.constant 0 : i32
    return %c0_i32, %c0_i32_0 : i32, i32
  }
  func.func @transform_4(%arg0: i32) -> (i32, i32) {
    %c0_i32 = arith.constant 0 : i32
    %c0_i32_0 = arith.constant 0 : i32
    %c0_i32_1 = arith.constant 0 : i32
    return %c0_i32, %c0_i32_0 : i32, i32
  }
  func.func @transform_5(%arg0: i32) -> (i32, i32) {
    %c0_i32 = arith.constant 0 : i32
    %c0_i32_0 = arith.constant 0 : i32
    %c0_i32_1 = arith.constant 0 : i32
    return %c0_i32, %c0_i32_0 : i32, i32
  }
  func.func @transform_6(%arg0: i32) -> (i32, i32) {
    %c0_i32 = arith.constant 0 : i32
    %c0_i32_0 = arith.constant 0 : i32
    %c0_i32_1 = arith.constant 0 : i32
    return %c0_i32, %c0_i32_0 : i32, i32
  }
  func.func @transform_7(%arg0: i32) -> (i32, i32) {
    %c0_i32 = arith.constant 0 : i32
    %c0_i32_0 = arith.constant 0 : i32
    %c0_i32_1 = arith.constant 0 : i32
    return %c0_i32, %c0_i32_0 : i32, i32
  }
  func.func @transform_8(%arg0: i32) -> (i32, i32) {
    %c0_i32 = arith.constant 0 : i32
    %c0_i32_0 = arith.constant 0 : i32
    return %arg0, %c0_i32 : i32, i32
  }
}

</mosaic_0001>

<bundles_post_ra>
// kernel: bigram_forward.1
= control target key start
LH: loop header
LB: loop body
LE: loop exit
PB: predicated region body
PF: predicated region fallthrough
CT: control target
= control target key end

     0   :  { %s1143_s27 = smov 0   ;;  %s1300_s0 = inlined_call_operand.vmem [shape: s32[16,1], index: 0, kind: input, shape index: {}]   ;;  %s1301_s1 = inlined_call_operand.vmem [shape: f32[8,64], index: 1, kind: input, shape index: {}]   ;;  %s1302_s2 = inlined_call_operand.vmem [shape: bf16[128,64], index: 2, kind: input, shape index: {}]   ;;  %s1303_s3 = inlined_call_operand.vmem [shape: bf16[64,64], index: 3, kind: input, shape index: {}]   ;;  %s1304_s4 = inlined_call_operand.vmem [shape: bf16[64,64], index: 4, kind: input, shape index: {}]   ;;  %s1305_s5 = inlined_call_operand.vmem [shape: bf16[64,64], index: 5, kind: input, shape index: {}]   ;;  %s1306_s6 = inlined_call_operand.vmem [shape: bf16[64,128], index: 6, kind: input, shape index: {}]   ;;  %s1307_s7 = inlined_call_operand.vmem [shape: f32[1,128], index: 7, kind: input, shape index: {}]   ;;  %s1308_s8 = inlined_call_operand.vmem [shape: f32[16,128], index: 8, kind: output, shape index: {}]  }
   0x1 LB: > { %s889_s28 = sadd.s32 4294967295, %s1092_s27   ;;  %p893_p0 = scmp.ge.s32.totalorder %s1092_s27, 1  ;;  %s1092_s27 = sphi %s1143_s27, %s18_s27  }
   0x2   : > { %p261_p1 = scmp.lt.s32.totalorder %s1092_s27, 3 }
   0x4   : > { %p262_p2 = pnand %p893_p0, %p261_p1 }
   0x5   : > { %p293_p3 = scmp.lt.s32.totalorder (!%p262_p2), %s889_s28, 1 }
   0x6   : > { %265 = sbr.rel (%p262_p2) target bundleno = 1459 (0x5b3), region = 52 }
   0xb   : > { %v1058_v0 = vld [vmem:[%s1302_s2 + $0x38] sm:$0xff]   ;;  %v1094_v1 = vmov 0   ;;  %v1095_v2 = vmov 0.0   ;;  %s1310_s28 = smov (!%p293_p3, %s889_s28), 1  ;;  %v1059_v3 = vld [vmem:[%s1302_s2 + $0x30] sm:$0xff]   ;;  %v1060_v5 = vld [vmem:[%s1302_s2 + $0x28] sm:$0xff]   ;;  %v303_v14 = vlaneseq }
   0xc   : > { %1057 = vset.pattern.permute.xlu0 %v1094_v1  ;;  %965 = vmatprep.subr.bf16.mxu0 %v1095_v2  ;;  %s894_s11 = sshll.u32 %s1310_s28, 3  ;;  %vm1096_vm0 = vmmov 0   ;;  %v1066_v6 = vld [vmem:[%s1303_s3 + $0x18] sm:$0xff]   ;;  %v1061_v7 = vld [vmem:[%s1302_s2 + $0x20] sm:$0xff]   ;;  %v1068_v8 = vld [vmem:[%s1303_s3 + $0x10] sm:$0xff]   ;;  %vm450_vm3 = vcmask 523264  }
   0xd   : > { %966 = vmatpush3.bf16.msra.mxu0 %v1058_v0  ;;  %985 = vmatprep.subr.bf16.mxu1 %v1095_v2  ;;  %s296_s14 = scalar_lea.vmem %s1300_s0, %s894_s11  ;;  %v1062_v9 = vld [vmem:[%s1302_s2 + $0x18] sm:$0xff]   ;;  %v1070_v10 = vld [vmem:[%s1303_s3 + $0x8] sm:$0xff]   ;;  %v1063_v11 = vld [vmem:[%s1302_s2 + $0x10] sm:$0xff]   ;;  %v1210_v15 = vand.u32 127, %v303_v14  ;;  %v1097_v18 = vmov 1.0|1.0   ;;  %s300_s29 = scalar_lea.vmem %s1308_s8, %s894_s11 }
   0xe   : > { %967 = vmatprep.subr.bf16.mxu0 %v1095_v2  ;;  %v302_v4 = vld [vmem:[%s296_s14] sm:$0xff]  ;;  %981 = vmatprep.mubr.msk.bf16.mxu0 %vm1096_vm0, %v1095_v2  ;;  %v1064_v12 = vld [vmem:[%s1302_s2 + $0x8] sm:$0xff]   ;;  %v1067_v17 = vld [vmem:[%s1305_s5 + $0x18] sm:$0xff]   ;;  %vm708_vm4 = vcmask 1043456   ;;  %v688_v52 = vshrl.u32 %v303_v14, 7  ;;  %vm691_vm6 = vcmask 64512  }
   0xf   : > { %306 = vperm.xlu0 %1057, %v302_v4   ;;  %993 = vmatprep.mubr.msk.bf16.mxu1 %vm1096_vm0, %v1095_v2  ;;  %v1065_v13 = vld [vmem:[%s1302_s2] sm:$0xff]   ;;  %v1069_v19 = vld [vmem:[%s1305_s5 + $0x10] sm:$0xff]   ;;  %v1071_v20 = vld [vmem:[%s1305_s5 + $0x8] sm:$0xff]  }
  0x10   : > { %986 = vmatpush3.bf16.msra.mxu1 %v1066_v6  ;;  %v1072_v21 = vld [vmem:[%s1303_s3] sm:$0xff]   ;;  %v1074_v27 = vld [vmem:[%s1304_s4 + $0x18] sm:$0xff]   ;;  %v1075_v31 = vld [vmem:[%s1304_s4 + $0x10] sm:$0xff]   ;;  %vm689_vm5 = vcmp.ge.s32.totalorder %v688_v52, %v1210_v15 }
  0x11   : > { %968 = vmatpush3.bf16.msra.mxu0 %v1059_v3  ;;  %987 = vmatprep.subr.bf16.mxu1 %v1095_v2  ;;  %v1073_v22 = vld [vmem:[%s1305_s5] sm:$0xff]   ;;  %v1076_v32 = vld [vmem:[%s1304_s4 + $0x8] sm:$0xff]   ;;  %v1078_v0 = vld [vmem:[%s1306_s6 + $0x18] sm:$0xff]  }
  0x12   : > { %969 = vmatprep.subr.bf16.mxu0 %v1095_v2  ;;  %v328_v23 = vld [vmem:[%s1301_s1] sm:$0xff]  ;;  %v1079_v1 = vld [vmem:[%s1306_s6 + $0x10] sm:$0xff]   ;;  %v1080_v3 = vld [vmem:[%s1306_s6 + $0x8] sm:$0xff]  }
  0x13   : > { %v1077_v33 = vld [vmem:[%s1304_s4] sm:$0xff]  }
  0x14   : > { %988 = vmatpush3.bf16.msra.mxu1 %v1068_v8  ;;  %v1081_v8 = vld [vmem:[%s1306_s6] sm:$0xff]  }
  0x15   : > { %970 = vmatpush3.bf16.msra.mxu0 %v1060_v5  ;;  %989 = vmatprep.subr.bf16.mxu1 %v1095_v2 }
  0x16   : > { %971 = vmatprep.subr.bf16.mxu0 %v1095_v2 }
  0x18   : > { %990 = vmatpush3.bf16.msra.mxu1 %v1070_v10 }
  0x19   : > { %972 = vmatpush3.bf16.msra.mxu0 %v1061_v7  ;;  %991 = vmatprep.subr.bf16.mxu1 %v1095_v2 }
  0x1a   : > { %973 = vmatprep.subr.bf16.mxu0 %v1095_v2 }
  0x1c   : > { %992 = vmatpush3.bf16.msra.mxu1 %v1072_v21 }
  0x1d   : > { %974 = vmatpush3.bf16.msra.mxu0 %v1062_v9  ;;  %997 = vmatprep.subr.bf16.mxu1 %v1095_v2 }
  0x1e   : > { %975 = vmatprep.subr.bf16.mxu0 %v1095_v2 }
  0x21   : > { %976 = vmatpush3.bf16.msra.mxu0 %v1063_v11 }
  0x22   : > { %977 = vmatprep.subr.bf16.mxu0 %v1095_v2 }
  0x25   : > { %978 = vmatpush3.bf16.msra.mxu0 %v1064_v12 }
  0x26   : > { %979 = vmatprep.subr.bf16.mxu0 %v1095_v2 }
  0x29   : > { %980 = vmatpush3.bf16.msra.mxu0 %v1065_v13  ;;  %v924_v13 = vld [vmem:[%s1307_s7] ss:$0 sm:$0xff] }
  0x2a   : > { %1009 = vmatprep.subr.bf16.mxu0 %v1095_v2 }
  0x8a   : > { %v307_v16 = vpop.permute.xlu0 %306 }
  0x8b   : > { %vm308_vm1 = vcmp.eq.s32.totalorder %v1210_v15, %v307_v16 }
  0x8c   : > { %vm905_vm2 = vmpackc.low %vm308_vm1, %vm308_vm1 }
  0x8d   : > { %982 = vmatmul.mubr.msk.bf16.vlgmr.msra.gmra.mxu0 %vm905_vm2, %v1097_v18 }
  0x8e   : > { %1010 = vmatpush3.bf16.msra.mxu0 %v1067_v17  ;;  %1017 = vmatprep.mubr.msk.bf16.mxu0 %vm1096_vm0, %v1095_v2 }
  0x8f   : > { %1011 = vmatprep.subr.bf16.mxu0 %v1095_v2 }
  0x92   : > { %1012 = vmatpush3.bf16.msra.mxu0 %v1069_v19 }
  0x93   : > { %1013 = vmatprep.subr.bf16.mxu0 %v1095_v2 }
  0x96   : > { %1014 = vmatpush3.bf16.msra.mxu0 %v1071_v20 }
  0x97   : > { %1015 = vmatprep.subr.bf16.mxu0 %v1095_v2 }
  0x9a   : > { %1016 = vmatpush3.bf16.msra.mxu0 %v1073_v22 }
  0x9b   : > { %1033 = vmatprep.subr.bf16.mxu0 %v1095_v2 }
 0x14d   : > { %v411_v24 = vpop.f32.mrf.mxu0 }
 0x14e   : > { %v412_v25 = vadd.f32 %v411_v24, %v328_v23 }
 0x14f   : > { %v983_v26 = vpop.f32.mrf.mxu0 }
 0x150   : > { %v417_v28 = vpack.c.bf16 %v412_v25, %v412_v25 }
 0x151   : > { %v414_v29 = vpop.f32.mrf.mxu0 }
 0x152   : > { %994 = vmatmul.mubr.msk.bf16.vlgmr.msra.gmra.mxu1 %vm450_vm3, %v417_v28  ;;  %1018 = vmatmul.mubr.msk.bf16.vlgmr.msra.gmra.mxu0 %vm450_vm3, %v417_v28 }
 0x153   : > { %998 = vmatpush3.bf16.msra.mxu1 %v1074_v27  ;;  %v984_v30 = vpop.f32.mrf.mxu0  ;;  %1005 = vmatprep.mubr.msk.bf16.mxu1 %vm1096_vm0, %v1095_v2 }
 0x154   : > { %999 = vmatprep.subr.bf16.mxu1 %v1095_v2  ;;  %1041 = vmatprep.mubr.msk.bf16.mxu0 %vm1096_vm0, %v1095_v2 }
 0x155   : > { %1034 = vmatpush3.bf16.msra.mxu0 %v1078_v0 }
 0x156   : > { %1035 = vmatprep.subr.bf16.mxu0 %v1095_v2 }
 0x157   : > { %1000 = vmatpush3.bf16.msra.mxu1 %v1075_v31 }
 0x158   : > { %1001 = vmatprep.subr.bf16.mxu1 %v1095_v2 }
 0x159   : > { %1036 = vmatpush3.bf16.msra.mxu0 %v1079_v1 }
 0x15a   : > { %1037 = vmatprep.subr.bf16.mxu0 %v1095_v2 }
 0x15b   : > { %1002 = vmatpush3.bf16.msra.mxu1 %v1076_v32 }
 0x15c   : > { %1003 = vmatprep.subr.bf16.mxu1 %v1095_v2 }
 0x15d   : > { %1038 = vmatpush3.bf16.msra.mxu0 %v1080_v3 }
 0x15e   : > { %1039 = vmatprep.subr.bf16.mxu0 %v1095_v2 }
 0x15f   : > { %1004 = vmatpush3.bf16.msra.mxu1 %v1077_v33 }
 0x160   : > { %1021 = vmatprep.subr.bf16.mxu1 %v1095_v2 }
 0x161   : > { %1040 = vmatpush3.bf16.msra.mxu0 %v1081_v8 }
 0x162   : > { %1006 = vmatmul.mubr.msk.bf16.vlgmr.msra.gmra.mxu1 %vm450_vm3, %v417_v28 }
 0x163   : > { %1023 = vmatprep.mubr.msk.bf16.mxu1 %vm1096_vm0, %v1095_v2 }
 0x212   : > { %v488_v34 = vpop.f32.mrf.mxu1  ;;  %v632_v35 = vpop.f32.mrf.mxu0 }
 0x213   : > { %v638_v47 = vmul.f32 0.125, %v488_v34  ;;  %v704_v49 = vpack.c.bf16 %v632_v35, %v632_v35 }
 0x214   : > { %v995_v36 = vpop.f32.mrf.mxu1  ;;  %v1019_v37 = vpop.f32.mrf.mxu0 }
 0x215   : > { %v639_v50 = vpack.c.bf16 %v638_v47, %v638_v47  ;;  %v710_v51 = vsel %vm708_vm4, %v704_v49, 0 }
 0x216   : > { %v491_v38 = vpop.f32.mrf.mxu1  ;;  %v635_v39 = vpop.f32.mrf.mxu0 }
 0x218   : > { %v996_v40 = vpop.f32.mrf.mxu1  ;;  %v1020_v41 = vpop.f32.mrf.mxu0 }
 0x222   : > { %v560_v42 = vpop.f32.mrf.mxu1 }
 0x223   : > { %v640_v43 = vpack.c.bf16 %v560_v42, %v560_v42 }
 0x224   : > { %v1007_v44 = vpop.f32.mrf.mxu1 }
 0x225   : > { %v645_v45 = vsel %vm450_vm3, %v640_v43, 0 }
 0x226   : > { %v563_v46 = vpop.f32.mrf.mxu1  ;;  %1022 = vmatpush3.bf16.xpose.msra.mxu1 %v645_v45 }
 0x227   : > { %1027 = vmatprep.subr.bf16.mxu1 %v1095_v2 }
 0x228   : > { %v1008_v48 = vpop.f32.mrf.mxu1 }
 0x22d   : > { %1024 = vmatmul.mubr.msk.bf16.vlgmr.msra.gmra.mxu1 %vm450_vm3, %v639_v50 }
 0x22e   : > { %1028 = vmatpush3.bf16.msra.mxu1 %v710_v51  ;;  %1029 = vmatprep.mubr.msk.bf16.mxu1 %vm1096_vm0, %v1095_v2 }
 0x2ed   : > { %v681_v53 = vpop.f32.mrf.mxu1 }
 0x2ee   : > { %v690_v54 = vsel %vm689_vm5, %v681_v53, -1e+30 }
 0x2ef   : > { %v1025_v55 = vpop.f32.mrf.mxu1  ;;  %v692_v56 = vsel %vm691_vm6, %v690_v54, -inf }
 0x2f0   : > { %693 = vmax.xlane.f32.xlu0 %v692_v56 }
 0x2f1   : > { %v684_v57 = vpop.f32.mrf.mxu1 }
 0x2f3   : > { %v1026_v58 = vpop.f32.mrf.mxu1 }
 0x379   : > { %v694_v59 = vpop.xlane.xlu0 %693 }
 0x37a   : > { %v695_v60 = vsub.f32 %v690_v54, %v694_v59 }
 0x37c   : > { %v696_v61 = vmul.f32 1.442695, %v695_v60 }
 0x37e   : > { %1082 = vpow2.f32 %v696_v61 }
 0x38b   : > { %v1083_v62 = vpop.eup %1082 }
 0x38c   : > { %v698_v63 = vsel %vm691_vm6, %v1083_v62, 0.0 }
 0x38d   : > { %699 = vadd.xlane.f32.xlu1 %v698_v63 }
 0x416   : > { %v700_v4 = vpop.xlane.xlu1 %699 }
 0x417   : > { %1084 = vrcp.f32 %v700_v4 }
 0x424   : > { %v1085_v5 = vpop.eup %1084 }
 0x425   : > { %v702_v6 = vmul.f32 %v1085_v5, %v1083_v62 }
 0x427   : > { %v703_v7 = vpack.c.bf16 %v702_v6, %v702_v6 }
 0x429   : > { %1030 = vmatmul.mubr.msk.bf16.vlgmr.msra.gmra.mxu1 %vm691_vm6, %v703_v7 }
 0x4e9   : > { %v746_v9 = vpop.f32.mrf.mxu1 }
 0x4ea   : > { %v752_v10 = vpack.c.bf16 %v746_v9, %v746_v9 }
 0x4eb   : > { %v1031_v11 = vpop.f32.mrf.mxu1 }
 0x4ec   : > { %1042 = vmatmul.mubr.msk.bf16.vlgmr.msra.gmra.mxu0 %vm450_vm3, %v752_v10 }
 0x4ed   : > { %v749_v12 = vpop.f32.mrf.mxu1 }
 0x4ef   : > { %v1032_v2 = vpop.f32.mrf.mxu1 }
 0x5ac   : > { %v829_v14 = vpop.f32.mrf.mxu0 }
 0x5ad   : > { %v830_v15 = vadd.f32 %v924_v13, %v829_v14 }
 0x5ae   : > { %v1043_v16 = vpop.f32.mrf.mxu0 }
 0x5af   : > { %835 = vst [vmem:[%s300_s29] sm:$0xff] %v830_v15 }
 0x5b0   : > { %v832_v17 = vpop.f32.mrf.mxu0 }
 0x5b2   : > { %v1044_v18 = vpop.f32.mrf.mxu0 }
 0x5b3 PF: > { %s18_s27 = sadd.s32 1, %s1092_s27  }
 0x5b4   : > { %p15_p4 = scmp.ge.s32.totalorder %s18_s27, 4  }
 0x5b6   :  { %17 = sbr.rel (!%p15_p4) target bundleno = 1 (0x1), region = 82 }

</bundles_post_ra>
